<compile_context>
chip_gen: v7x
topology: tpu7x:2x2x1
jax: 0.10.0
libtpu: 0.0.40
codegen_flags: <defaults>
</compile_context>

<pallas_src>
import math

import jax
import jax.numpy as jnp
from jax.experimental import pallas as pl
from jax.experimental.pallas import tpu as pltpu


# ----------------------------------------------------------------------------
# helpers
# ----------------------------------------------------------------------------
def _round_up(x, m):
    return -(-x // m) * m


def _pad_hidden(H):
    """Lane-aligned padded hidden size; prefer 256-multiples (v6e/v7x MXU)."""
    return 128 if H <= 128 else _round_up(H, 256)


def _tile_h(Hp):
    for t in (512, 256, 128):
        if Hp % t == 0:
            return t
    return 128


def _batch_tiling(B, cap=512):
    """Batch tile: multiple of 16 (bf16 sublanes), <= cap, minimal padding."""
    Br = _round_up(B, 16)
    n = -(-Br // cap)                     # number of batch tiles
    tb = _round_up(-(-Br // n), 16)
    return tb, n * tb                     # (tile, padded batch)


# ----------------------------------------------------------------------------
# kernels
# ----------------------------------------------------------------------------
def _rhs_kernel_resident(ind_ref, y_ref, wt_ref, bias_ref, c2_ref, out_ref):
    """Full-K path: W[ind] is grid-constant (DMA'd once), single MXU call."""
    del ind_ref                                            # used by index_maps
    y_bf = y_ref[...]                                      # (tb, Hp) bf16
    f = jnp.dot(y_bf, wt_ref[...], preferred_element_type=jnp.float32)
    out_ref[...] = f + bias_ref[...] + c2_ref[0] * y_bf.astype(jnp.float32)


def _rhs_kernel_tiled(ind_ref, y_mm_ref, wt_ref, bias_ref, y_epi_ref, c2_ref,
                      out_ref):
    """K-tiled path: accumulate directly into the resident f32 output block."""
    del ind_ref
    k = pl.program_id(2)

    @pl.when(k == 0)
    def _init():
        out_ref[...] = jnp.zeros_like(out_ref)

    out_ref[...] += jnp.dot(y_mm_ref[...], wt_ref[...],
                            preferred_element_type=jnp.float32)

    @pl.when(k == pl.num_programs(2) - 1)
    def _epilogue():
        out_ref[...] = (out_ref[...] + bias_ref[...]
                        + c2_ref[0] * y_epi_ref[...].astype(jnp.float32))


# ----------------------------------------------------------------------------
# parameter construction / one-time kernel-side preparation
# ----------------------------------------------------------------------------
def make_params(key, hidden, num_steps):
    """Deterministic init mirroring rhs_base.__init__ (learn_scales=False,
    learn_shift=False).  Weights stored in (num_steps, H_in, H_out) layout."""
    ini_sigmoid = 0.99
    inv_sigmoid = math.log(ini_sigmoid / (1.0 - ini_sigmoid))
    limit = math.sqrt(6.0 / (hidden + hidden))          # xavier-uniform-ish
    Wt = jax.random.uniform(key, (num_steps, hidden, hidden),
                            minval=-limit, maxval=limit, dtype=jnp.float32)
    return {
        "Wt": Wt,                                               # (S, H_in, H_out)
        "bias": jnp.zeros((num_steps, hidden), jnp.float32),    # (S, H)
        "scales": jnp.full((1, hidden), inv_sigmoid, jnp.float32),
        "shifta": jnp.float32(inv_sigmoid),
        "shiftb": jnp.float32(inv_sigmoid),
    }


def prepare_rhs_kernel_params(params, *, T, eigmin=-1.0, eiginit=0.0, eigmax=1.0):
    """One-time (per parameter update) preparation.  Folds the constant
    per-column scale cs = 0.5*(b-a)*sigmoid(scales) into W and bias, pads the
    hidden dim to a lane-aligned size and casts the weight bank to bf16.
    Nothing here runs in the per-call forward path."""
    Wt = params["Wt"]                     # (S, H, H) f32
    bias = params["bias"]                 # (S, H)
    scales = params["scales"]             # (1, H)
    S, H, _ = Wt.shape

    a = eiginit + jax.nn.sigmoid(params["shifta"]) * (eigmin - eiginit)
    b = eiginit + jax.nn.sigmoid(params["shiftb"]) * (eigmax - eiginit)
    cs = (0.5 * (b - a) * jax.nn.sigmoid(scales)).astype(jnp.float32)  # (1, H)
    c2 = (0.5 * (a + b)).astype(jnp.float32)

    Wt_s = Wt * cs.reshape(1, 1, H)       # scale output columns
    bias_s = bias * cs                    # (S, H)

    Hp = _pad_hidden(H)
    if Hp != H:
        pad = Hp - H
        Wt_s = jnp.pad(Wt_s, ((0, 0), (0, pad), (0, pad)))
        bias_s = jnp.pad(bias_s, ((0, 0), (0, pad)))

    return {
        "Wt_bf16": Wt_s.astype(jnp.bfloat16),      # (S, Hp, Hp) bf16, cs folded
        "bias": bias_s.reshape(S, 1, Hp),          # (S, 1, Hp) f32, cs folded
        "c2": jnp.reshape(c2, (1,)),               # (1,) f32 SMEM scalar
        "H": H, "Hp": Hp, "tile_h": _tile_h(Hp),
        "num_steps": S, "h": T / S,
    }


# ----------------------------------------------------------------------------
# forward (scalar-t path)
# ----------------------------------------------------------------------------
def rhs_base_forward(t, y, kparams, *, force_tiled=False):
    S, H, Hp, th = (kparams["num_steps"], kparams["H"], kparams["Hp"],
                    kparams["tile_h"])
    # t2ind, scalar branch; clamped below 0 to avoid an unchecked OOB DMA.
    ind = max(0, min(int(t / kparams["h"]), S - 1))
    ind_arr = jnp.array([ind], dtype=jnp.int32)

    B = y.shape[0]
    tb, Bp = _batch_tiling(B)

    y_bf16 = y.astype(jnp.bfloat16)
    if (Bp, Hp) != (B, H):
        y_bf16 = jnp.pad(y_bf16, ((0, Bp - B), (0, Hp - H)))

    c2 = kparams["c2"]

    use_resident = (Hp <= 1024) and not force_tiled

    if use_resident:
        # W[ind] fully VMEM-resident: grid-constant block index => single DMA.
        grid_spec = pltpu.PrefetchScalarGridSpec(
            num_scalar_prefetch=1,
            grid=(Bp // tb,),
            in_specs=[
                pl.BlockSpec((tb, Hp), lambda i, ind: (i, 0)),            # y
                pl.BlockSpec((None, Hp, Hp), lambda i, ind: (ind[0], 0, 0)),
                pl.BlockSpec((None, 1, Hp), lambda i, ind: (ind[0], 0, 0)),
                pl.BlockSpec(memory_space=pltpu.MemorySpace.SMEM),        # c2
            ],
            out_specs=pl.BlockSpec((tb, Hp), lambda i, ind: (i, 0)),
        )
        out_p = pl.pallas_call(
            _rhs_kernel_resident,
            out_shape=jax.ShapeDtypeStruct((Bp, Hp), jnp.float32),
            grid_spec=grid_spec,
            compiler_params=pltpu.CompilerParams(
                dimension_semantics=("parallel",),
                vmem_limit_bytes=32 * 1024 * 1024),
        )(ind_arr, y_bf16, kparams["Wt_bf16"], kparams["bias"], c2)
    else:
        # K-tiled path: accumulate into the resident f32 output block.
        # (pipeline_mode=pl.Buffered(3) on the weight spec is a further
        #  tuning knob if the weight DMA is exposed at small tb.)
        grid = (Bp // tb, Hp // th, Hp // th)
        grid_spec = pltpu.PrefetchScalarGridSpec(
            num_scalar_prefetch=1,
            grid=grid,
            in_specs=[
                # y (bf16) matmul operand: (tb, tk) at (i, k)
                pl.BlockSpec((tb, th), lambda i, j, k, ind: (i, k)),
                # W[ind] tile: (tk, tn) at (k, j)
                pl.BlockSpec((None, th, th), lambda i, j, k, ind: (ind[0], k, j)),
                # bias[ind]: (1, tn) at column tile j
                pl.BlockSpec((None, 1, th), lambda i, j, k, ind: (ind[0], 0, j)),
                # same y (bf16) for the epilogue c2*y term: (tb, tn) at (i, j)
                pl.BlockSpec((tb, th), lambda i, j, k, ind: (i, j)),
                # c2 scalar in SMEM
                pl.BlockSpec(memory_space=pltpu.MemorySpace.SMEM),
            ],
            out_specs=pl.BlockSpec((tb, th), lambda i, j, k, ind: (i, j)),
        )
        out_p = pl.pallas_call(
            _rhs_kernel_tiled,
            out_shape=jax.ShapeDtypeStruct((Bp, Hp), jnp.float32),
            grid_spec=grid_spec,
            compiler_params=pltpu.CompilerParams(
                dimension_semantics=("parallel", "parallel", "arbitrary"),
                vmem_limit_bytes=32 * 1024 * 1024),
        )(ind_arr, y_bf16, kparams["Wt_bf16"], kparams["bias"], y_bf16, c2)

    if (Bp, Hp) != (B, H):
        out_p = out_p[:B, :H]
    return out_p


# ----------------------------------------------------------------------------
# plain-JAX reference (f32, matches the PyTorch semantics)
# ----------------------------------------------------------------------------
def rhs_base_forward_ref(t, y, params, *, T, num_steps, eigmin, eiginit, eigmax):
    h = T / num_steps
    ind = max(0, min(int(t / h), num_steps - 1))
    f = y @ params["Wt"][ind] + params["bias"][ind]
    f = jax.nn.sigmoid(params["scales"]) * f
    a = eiginit + jax.nn.sigmoid(params["shifta"]) * (eigmin - eiginit)
    b = eiginit + jax.nn.sigmoid(params["shiftb"]) * (eigmax - eiginit)
    return 0.5 * ((b - a) * f + (a + b) * y)


# ----------------------------------------------------------------------------
if __name__ == "__main__":
    # small config: shape=(32,), T=1.0, num_steps=4, spectral_limits=(-2,-0.5,1)
    # (non-default limits so the c2*y epilogue term is actually exercised)
    hidden, num_steps, T = 32, 4, 1.0
    eigmin, eiginit, eigmax = -2.0, -0.5, 1.0
    batch = 4
    t = 0.6   # -> ind = min(int(0.6 / 0.25), 3) = 2

    key = jax.random.PRNGKey(0)
    kp, ky = jax.random.split(key)
    params = make_params(kp, hidden, num_steps)
    kparams = prepare_rhs_kernel_params(params, T=T, eigmin=eigmin,
                                        eiginit=eiginit, eigmax=eigmax)
    y = jax.random.normal(ky, (batch, hidden), dtype=jnp.float32)

    ref = rhs_base_forward_ref(t, y, params, T=T, num_steps=num_steps,
                               eigmin=eigmin, eiginit=eiginit, eigmax=eigmax)

    # Weight-resident fast path (what small/medium H uses in practice).
    out_res = jax.block_until_ready(rhs_base_forward(t, y, kparams))
    # K-tiled accumulator path (used automatically for large H); forced here
    # at small shapes so both kernels are compile- and correctness-checked.
    out_til = jax.block_until_ready(rhs_base_forward(t, y, kparams,
                                                     force_tiled=True))

    assert out_res.shape == (batch, hidden) and out_res.dtype == jnp.float32
    assert out_til.shape == (batch, hidden) and out_til.dtype == jnp.float32
    # bf16 MXU operands (and bf16 y in the c2*y term) vs. the f32 reference.
    assert jnp.allclose(out_res, ref, atol=5e-2, rtol=5e-2), "resident mismatch"
    assert jnp.allclose(out_til, ref, atol=5e-2, rtol=5e-2), "tiled mismatch"
    print("KERNEL_OK")
</pallas_src>

<mosaic_0001>
module attributes {stable_mosaic.version = 11 : i64} {
  func.func @_rhs_kernel_resident(%arg0: i32, %arg1: memref<1xi32, #tpu.memory_space<smem>>, %arg2: memref<16x128xbf16, #tpu.memory_space<vmem>>, %arg3: memref<1x128x128xbf16, #tpu.memory_space<vmem>>, %arg4: memref<1x1x128xf32, #tpu.memory_space<vmem>>, %arg5: memref<1xf32, #tpu.memory_space<smem>>, %arg6: memref<16x128xf32, #tpu.memory_space<vmem>>) attributes {dimension_semantics = [#tpu.dimension_semantics<parallel>], iteration_bounds = array<i64: 1>, scalar_prefetch = 1 : i64, scratch_operands = 0 : i64, tpu.core_type = #tpu.core_type<tc>, window_params = [{transform_indices = @transform_0, window_bounds = array<i64: 16, 128>}, {transform_indices = @transform_1, window_bounds = array<i64: 1, 128, 128>}, {transform_indices = @transform_2, window_bounds = array<i64: 1, 1, 128>}, {transform_indices = @transform_3, window_bounds = array<i64: 1>}, {transform_indices = @transform_4, window_bounds = array<i64: 16, 128>}]} {
    %c0 = arith.constant 0 : index
    %c0_0 = arith.constant 0 : index
    %0 = vector.load %arg2[%c0, %c0_0] : memref<16x128xbf16, #tpu.memory_space<vmem>>, vector<16x128xbf16>
    %c0_1 = arith.constant 0 : index
    %c0_2 = arith.constant 0 : index
    %c0_3 = arith.constant 0 : index
    %1 = vector.load %arg3[%c0_1, %c0_2, %c0_3] : memref<1x128x128xbf16, #tpu.memory_space<vmem>>, vector<1x128x128xbf16>
    %2 = vector.shape_cast %1 : vector<1x128x128xbf16> to vector<128x128xbf16>
    %cst = arith.constant dense<0.000000e+00> : vector<16x128xf32>
    %3 = tpu.matmul %0, %2, %cst {dimension_numbers = #tpu.dot_dimension_numbers<[1], [0], [0], [1], [0, 0, 1, 1], [], []>} : vector<16x128xbf16>, vector<128x128xbf16>, vector<16x128xf32> -> vector<16x128xf32>
    %c0_4 = arith.constant 0 : index
    %c0_5 = arith.constant 0 : index
    %c0_6 = arith.constant 0 : index
    %4 = vector.load %arg4[%c0_4, %c0_5, %c0_6] : memref<1x1x128xf32, #tpu.memory_space<vmem>>, vector<1x1x128xf32>
    %5 = vector.shape_cast %4 : vector<1x1x128xf32> to vector<1x128xf32>
    %6 = vector.broadcast %5 : vector<1x128xf32> to vector<16x128xf32>
    %7 = arith.addf %3, %6 : vector<16x128xf32>
    %c0_7 = arith.constant 0 : index
    %8 = memref.load %arg5[%c0_7] : memref<1xf32, #tpu.memory_space<smem>>
    %9 = arith.extf %0 : vector<16x128xbf16> to vector<16x128xf32>
    %10 = vector.broadcast %8 : f32 to vector<16x128xf32>
    %11 = arith.mulf %10, %9 : vector<16x128xf32>
    %12 = arith.addf %7, %11 : vector<16x128xf32>
    %c0_8 = arith.constant 0 : index
    %c0_9 = arith.constant 0 : index
    %13 = vector.load %arg6[%c0_8, %c0_9] : memref<16x128xf32, #tpu.memory_space<vmem>>, vector<16x128xf32>
    tpu.vector_store %arg6[%c0_8, %c0_9], %12 {strides = array<i32>} : memref<16x128xf32, #tpu.memory_space<vmem>>, vector<16x128xf32>,
    return
  }
  func.func @transform_0(%arg0: i32, %arg1: memref<1xi32, #tpu.memory_space<smem>>) -> (i32, i32) {
    %c0_i32 = arith.constant 0 : i32
    %c0_i32_0 = arith.constant 0 : i32
    return %arg0, %c0_i32 : i32, i32
  }
  func.func @transform_1(%arg0: i32, %arg1: memref<1xi32, #tpu.memory_space<smem>>) -> (i32, i32, i32) {
    %c0 = arith.constant 0 : index
    %0 = memref.load %arg1[%c0] : memref<1xi32, #tpu.memory_space<smem>>
    %c0_i32 = arith.constant 0 : i32
    %c0_i32_0 = arith.constant 0 : i32
    %c0_i32_1 = arith.constant 0 : i32
    return %0, %c0_i32, %c0_i32_0 : i32, i32, i32
  }
  func.func @transform_2(%arg0: i32, %arg1: memref<1xi32, #tpu.memory_space<smem>>) -> (i32, i32, i32) {
    %c0 = arith.constant 0 : index
    %0 = memref.load %arg1[%c0] : memref<1xi32, #tpu.memory_space<smem>>
    %c0_i32 = arith.constant 0 : i32
    %c0_i32_0 = arith.constant 0 : i32
    %c0_i32_1 = arith.constant 0 : i32
    return %0, %c0_i32, %c0_i32_0 : i32, i32, i32
  }
  func.func @transform_3(%arg0: i32, %arg1: memref<1xi32, #tpu.memory_space<smem>>) -> i32 {
    %c0_i32 = arith.constant 0 : i32
    %c0_i32_0 = arith.constant 0 : i32
    return %c0_i32 : i32
  }
  func.func @transform_4(%arg0: i32, %arg1: memref<1xi32, #tpu.memory_space<smem>>) -> (i32, i32) {
    %c0_i32 = arith.constant 0 : i32
    %c0_i32_0 = arith.constant 0 : i32
    return %arg0, %c0_i32 : i32, i32
  }
}

</mosaic_0001>

<bundles_post_ra>
// kernel: tpu_custom_call.1
= control target key start
LH: loop header
LB: loop body
LE: loop exit
PB: predicated region body
PF: predicated region fallthrough
CT: control target
= control target key end

     0   :  { %12 = vsyncpa [#allocation6], 0  ;;  %s444_s0 = inlined_call_operand.<no memory space> [shape: s32[1], index: 0, kind: input, shape index: {}]   ;;  %s445_s1 = inlined_call_operand.hbm [shape: bf16[16,128], index: 1, kind: input, shape index: {}]   ;;  %s446_s2 = inlined_call_operand.hbm [shape: bf16[4,128,128], index: 2, kind: input, shape index: {}]   ;;  %s447_s3 = inlined_call_operand.vmem [shape: f32[4,1,128], index: 3, kind: input, shape index: {}]   ;;  %s448_s4 = inlined_call_operand.<no memory space> [shape: f32[1], index: 4, kind: input, shape index: {}]   ;;  %s449_s5 = inlined_call_operand.hbm [shape: f32[16,128], index: 5, kind: output, shape index: {}]  }
   0x1   :  { %13 = vsyncpa [#allocation9], 0 }
   0x2   :  { %14 = vsyncpa [#allocation7], 0  ;;  %s357_s18 = smov [#allocation5]   ;;  %s234_s22 = sshll.u32 %s444_s0, 10 }
   0x3   :  { %s20_s19 = sshll.u32 %s357_s18, 4  ;;  %s283_s25 = scalar_lea.hbm %s445_s1, 128  ;;  %s21_s19 = int_to_ptr.vmem [resolvable:$true] %s20_s19 }
   0x4   :  { %p284_p0 = scmp.ne.s32.totalorder %s445_s1, %s283_s25  ;;  %p287_p1 = scmp.lt.u32.totalorder %s283_s25, %s445_s1 }
   0x6   :  { %p289_p2 = pnand %p287_p1, %p284_p0 }
   0x8   :  { %292 = shalt.err (!%p289_p2)
}
   0x9   :  { %s293_s30 = scalar_lea.vmem %s21_s19, 128  ;;  %p298_p4 = scmp.lt.s32.totalorder %s21_s19, %s21_s19 }
   0xa   :  { %p294_p3 = scmp.ne.s32.totalorder %s21_s19, %s293_s30  ;;  %p299_p5 = scmp.lt.s32.totalorder %s293_s30, %s293_s30 }
   0xc   :  { %p300_p6 = por %p299_p5, %p298_p4 }
   0xe   :  { %p301_p7 = pnand %p300_p6, %p294_p3 }
  0x10   :  { %304 = shalt.err (!%p301_p7)
}
  0x11   :  { %s358_s6 = smov 64   ;;  %s359_s7 = smov 4  }
  0x12   :  { %26 = dma.hbm_to_vmem [thread:$0]  %s445_s1, 128, %s21_s19, [#allocation6], %s358_s6, %s358_s6, %s359_s7  }
  0x13   :  { %s35_s12 = scalar_lea.hbm %s446_s2, %s234_s22  ;;  %s360_s13 = smov [#allocation8]  }
  0x14   :  { %s36_s14 = sshll.u32 %s360_s13, 4  ;;  %s305_s15 = scalar_lea.hbm %s35_s12, 1024  ;;  %s37_s14 = int_to_ptr.vmem [resolvable:$true] %s36_s14 }
  0x15   :  { %p306_p8 = scmp.ne.s32.totalorder %s35_s12, %s305_s15  ;;  %s307_s18 = scalar_lea.hbm %s446_s2, 4096 }
  0x16   :  { %p308_p9 = scmp.lt.u32.totalorder %s35_s12, %s446_s2  ;;  %p309_p10 = scmp.lt.u32.totalorder %s307_s18, %s305_s15 }
  0x17   :  { %p311_p12 = scmp.lt.u32.totalorder %s305_s15, %s35_s12 }
  0x18   :  { %p310_p11 = por %p309_p10, %p308_p9 }
  0x1a   :  { %p312_p13 = por %p311_p12, %p310_p11 }
  0x1c   :  { %p313_p0 = pnand %p312_p13, %p306_p8 }
  0x1e   :  { %316 = shalt.err (!%p313_p0)
}
  0x1f   :  { %s317_s1 = scalar_lea.vmem %s37_s14, 1024  ;;  %p322_p2 = scmp.lt.s32.totalorder %s37_s14, %s37_s14 }
  0x20   :  { %p318_p1 = scmp.ne.s32.totalorder %s37_s14, %s317_s1  ;;  %p323_p3 = scmp.lt.s32.totalorder %s317_s1, %s317_s1 }
  0x22   :  { %p324_p4 = por %p323_p3, %p322_p2 }
  0x24   :  { %p325_p5 = pnand %p324_p4, %p318_p1 }
  0x26   :  { %328 = shalt.err (!%p325_p5)
}
  0x27   :  { %42 = dma.hbm_to_vmem [thread:$0]  %s35_s12, 1024, %s37_s14, [#allocation9], %s358_s6, %s358_s6, %s359_s7  }
  0x28   :  { %351 = dma.done.wait [#allocation6], 128  }
  0x29   :  { %352 = vsyncadd [#allocation6], 4294967168 }
  0x2a   :  { %353 = dma.done.wait [#allocation9], 1024  }
  0x2b   :  { %354 = vsyncadd [#allocation9], 4294966272  ;;  %v361_v0 = vmov 0.0   ;;  %vm362_vm0 = vmmov 0   ;;  %v273_v1 = vld [vmem:[#allocation8] sm:$0xff]   ;;  %v274_v2 = vld [vmem:[#allocation8 + $0x8] sm:$0xff]   ;;  %v192_v11 = vstv %s448_s4 }
  0x2c   :  { %244 = vmatprep.subr.bf16.mxu0 %v361_v0  ;;  %260 = vmatprep.mubr.msk.bf16.mxu0 %vm362_vm0, %v361_v0  ;;  %v275_v3 = vld [vmem:[#allocation8 + $0x10] sm:$0xff]   ;;  %v276_v4 = vld [vmem:[#allocation8 + $0x18] sm:$0xff]   ;;  %v277_v5 = vld [vmem:[#allocation8 + $0x20] sm:$0xff]   ;;  %p64_p6 = scmp.lt.s32.totalorder %s444_s0, 3  ;;  %s363_s29 = smov [#allocation10]  }
  0x2d   :  { %245 = vmatpush3.bf16.msra.mxu0 %v273_v1  ;;  %v278_v6 = vld [vmem:[#allocation8 + $0x28] sm:$0xff]   ;;  %v279_v7 = vld [vmem:[#allocation8 + $0x30] sm:$0xff]   ;;  %v280_v8 = vld [vmem:[#allocation8 + $0x38] sm:$0xff]   ;;  %s204_s30 = sshll.u32 %s363_s29, 4  ;;  %s205_s30 = int_to_ptr.vmem [resolvable:$true] %s204_s30 }
  0x2e   :  { %246 = vmatprep.subr.bf16.mxu0 %v361_v0  ;;  %v69_v9 = vld [vmem:[#allocation5] sm:$0xff]   ;;  %s451_s0 = smov (!%p64_p6, %s444_s0), 3  ;;  %p334_p8 = scmp.lt.s32.totalorder %s205_s30, %s205_s30 }
  0x2f   :  { %v190_v10 = vunpack.c.l.bf16 %v69_v9  ;;  %s66_s26 = scalar_lea.vmem %s447_s3, %s451_s0  ;;  %v191_v12 = vunpack.c.h.bf16 %v69_v9  ;;  %s329_s0 = scalar_lea.vmem %s205_s30, 256 }
  0x30   :  { %v224_v13 = vld [vmem:[%s66_s26] ss:$0 sm:$0xff]  ;;  %p330_p7 = scmp.ne.s32.totalorder %s205_s30, %s329_s0  ;;  %p335_p9 = scmp.lt.s32.totalorder %s329_s0, %s329_s0 }
  0x31   :  { %247 = vmatpush3.bf16.msra.mxu0 %v274_v2  ;;  %v193_v14 = vmul.f32 %v192_v11, %v190_v10  ;;  %v194_v18 = vmul.f32 %v192_v11, %v191_v12 }
  0x32   :  { %248 = vmatprep.subr.bf16.mxu0 %v361_v0  ;;  %p336_p10 = por %p335_p9, %p334_p8 }
  0x34   :  { %p337_p11 = pnand %p336_p10, %p330_p7 }
  0x35   :  { %249 = vmatpush3.bf16.msra.mxu0 %v275_v3 }
  0x36   :  { %250 = vmatprep.subr.bf16.mxu0 %v361_v0 }
  0x39   :  { %251 = vmatpush3.bf16.msra.mxu0 %v276_v4 }
  0x3a   :  { %252 = vmatprep.subr.bf16.mxu0 %v361_v0 }
  0x3d   :  { %253 = vmatpush3.bf16.msra.mxu0 %v277_v5 }
  0x3e   :  { %254 = vmatprep.subr.bf16.mxu0 %v361_v0 }
  0x41   :  { %255 = vmatpush3.bf16.msra.mxu0 %v278_v6 }
  0x42   :  { %256 = vmatprep.subr.bf16.mxu0 %v361_v0 }
  0x45   :  { %257 = vmatpush3.bf16.msra.mxu0 %v279_v7 }
  0x46   :  { %258 = vmatprep.subr.bf16.mxu0 %v361_v0 }
  0x49   :  { %259 = vmatpush3.bf16.msra.mxu0 %v280_v8 }
  0x4c   :  { %261 = vmatmul.mubr.bf16.vlgmr.msra.gmra.mrb[0].mxu0 %v69_v9 }
 0x11f   :  { %v182_v15 = vpop.f32.mrb[0].mxu0 }
 0x120   :  { %v183_v16 = vadd.f32 %v224_v13, %v182_v15  ;;  %v262_v17 = vpop.f32.mrb[1].mxu0 }
 0x121   :  { %v185_v19 = vpop.f32.mrb[2].mxu0 }
 0x122   :  { %v195_v20 = vadd.f32 %v193_v14, %v183_v16  ;;  %v186_v21 = vadd.f32 %v224_v13, %v185_v19  ;;  %v263_v22 = vpop.f32.mrb[3].mxu0 }
 0x124   :  { %197 = vst [vmem:[#allocation10] sm:$0xff] %v195_v20  ;;  %v196_v23 = vadd.f32 %v194_v18, %v186_v21 }
 0x126   :  { %198 = vst [vmem:[#allocation10 + $0x8] sm:$0xff] %v196_v23 }
 0x127   :  { %340 = shalt.err (!%p337_p11)
}
 0x128   :  { %s341_s6 = scalar_lea.hbm %s449_s5, 256 }
 0x129   :  { %p342_p12 = scmp.ne.s32.totalorder %s449_s5, %s341_s6  ;;  %p345_p13 = scmp.lt.u32.totalorder %s341_s6, %s449_s5 }
 0x12b   :  { %p347_p0 = pnand %p345_p13, %p342_p12 }
 0x12d   :  { %350 = shalt.err (!%p347_p0)
}
 0x12e   :  { %s364_s11 = smov 128   ;;  %s365_s12 = smov 8  }
 0x12f   :  { %210 = dma.vmem_to_hbm [thread:$0]  %s205_s30, 256, %s449_s5, [#allocation7], %s364_s11, %s364_s11, %s365_s12  }
 0x130   :  { %355 = dma.done.wait [#allocation7], 256  }
 0x131   :  { %356 = vsyncadd [#allocation7], 4294967040 }
 0x132   :  { %214 = vsyncpa [#allocation6], 1 }
 0x133   :  { %215 = vsyncpa [#allocation9], 1 }
 0x134   :  { %216 = vsyncpa [#allocation7], 1 }

</bundles_post_ra>
